<compile_context>
chip_gen: v7x
topology: tpu7x:2x2x1
jax: 0.10.0
libtpu: 0.0.40
codegen_flags: <defaults>
</compile_context>

<pallas_src>
import functools

import jax
import jax.numpy as jnp
from jax.experimental import pallas as pl
from jax.experimental.pallas import tpu as pltpu


# ---------------------------------------------------------------------------
# Pallas kernel: fused 3x3 conv (9 shifted matmuls) + bias + SiLU
# ---------------------------------------------------------------------------
def _conv3x3_silu_kernel(x_ref, w_ref, b_ref, o_ref, *, m_pad, shifts):
    # x_ref: [C_in, Lin]       bf16  flattened zero-padded row-tile (incl. halo)
    # w_ref: [9, C_out, C_in]  bf16  tap-major weights, tap = ky*3 + kx
    # b_ref: [C_out, 1]        f32
    # o_ref: [C_out, M_pad]    f32   M_pad = round_up(TH*Wp, 128) (lane-dense)
    c_out = o_ref.shape[0]
    acc = jnp.zeros((c_out, m_pad), jnp.float32)
    for t, s in enumerate(shifts):                       # static unroll: 9 taps
        lhs = w_ref[t]                                   # [C_out, C_in] bf16
        rhs = x_ref[:, s:s + m_pad]                      # [C_in,  M_pad] bf16
        acc = acc + jnp.dot(lhs, rhs, preferred_element_type=jnp.float32)
    acc = acc + b_ref[...]                               # bias broadcast (f32)
    o_ref[...] = acc * jax.nn.sigmoid(acc)               # SiLU in f32 (v5e-safe)


def _round_up(x, m):
    return (x + m - 1) // m * m


def _pick_row_tile(h, wp, target_pixels=2048):
    """Largest divisor TH of H such that the output tile TH*Wp <= target."""
    best = 1
    for th in range(1, h + 1):
        if h % th == 0 and th * wp <= target_pixels:
            best = th
    return best


@jax.jit
def conv3x3_silu_pallas(x, w_taps, bias_col):
    """SAME-padded 3x3 conv (stride 1) + bias + SiLU.

    x:        [B, C_in, H, W]      f32 (NCHW)
    w_taps:   [9, C_out, C_in]     bf16, tap = ky*3 + kx
    bias_col: [C_out, 1]           f32
    """
    B, C, H, W = x.shape
    _, c_out, c_in = w_taps.shape
    assert c_in == C

    wp = W + 2                                   # padded width
    th = _pick_row_tile(H, wp)                   # output rows per tile
    n_h = H // th
    g = B * n_h                                  # grid size
    m_out = th * wp                              # valid output lanes per tile
    m_pad = _round_up(m_out, 128)                # lane-dense (unmasked) stores
    lin = _round_up(2 * wp + 2 + m_pad, 128)     # covers the last tap's slice

    # --- cheap host-side prep: pad + row-tile with halo (no im2col) ---------
    xp = jnp.pad(x, ((0, 0), (0, 0), (1, 1), (1, 1)))            # [B,C,H+2,Wp]
    rows = [xp[:, :, j * th:j * th + th + 2, :] for j in range(n_h)]
    xt = jnp.stack(rows, axis=1)                                 # [B,n_h,C,TH+2,Wp]
    xt = xt.reshape(g, C, (th + 2) * wp)
    xt = jnp.pad(xt, ((0, 0), (0, 0), (0, lin - (th + 2) * wp)))
    xt = xt.astype(jnp.bfloat16)

    shifts = tuple(ky * wp + kx for ky in range(3) for kx in range(3))
    kernel = functools.partial(_conv3x3_silu_kernel, m_pad=m_pad, shifts=shifts)

    flops = 2 * g * c_out * (9 * C) * m_pad
    cost = pl.CostEstimate(
        flops=flops,
        transcendentals=g * c_out * m_pad,
        bytes_accessed=(xt.size * 2 + w_taps.size * 2 + bias_col.size * 4
                        + g * c_out * m_pad * 4),
    )

    out = pl.pallas_call(
        kernel,
        out_shape=jax.ShapeDtypeStruct((g, c_out, m_pad), jnp.float32),
        grid=(g,),
        in_specs=[
            pl.BlockSpec((None, C, lin), lambda i: (i, 0, 0)),      # per-tile input
            pl.BlockSpec((9, c_out, c_in), lambda i: (0, 0, 0)),    # resident weights
            pl.BlockSpec((c_out, 1), lambda i: (0, 0)),             # resident bias
        ],
        out_specs=pl.BlockSpec((None, c_out, m_pad), lambda i: (i, 0, 0)),
        compiler_params=pltpu.CompilerParams(
            dimension_semantics=("parallel",),
            vmem_limit_bytes=32 * 1024 * 1024,
        ),
        cost_estimate=cost,
    )(xt, w_taps, bias_col)

    # [G, C_out, M_pad] -> crop padding lanes -> [B, C_out, H, W].
    # With n_h == 1 the transpose is a free view; the column crop just drops
    # the 2 padded columns per row.
    out = out[:, :, :m_out].reshape(B, n_h, c_out, th, wp)
    out = out.transpose(0, 2, 1, 3, 4).reshape(B, c_out, H, wp)
    return out[:, :, :, :W]


# ---------------------------------------------------------------------------
# Synthetic inner model (Conv2d 4->8, k=3, pad=1, stride=1) + SiLU
# ---------------------------------------------------------------------------
class InnerConvSiLU:
    def __init__(self, key, c_in=4, c_out=8, k=3):
        assert k == 3, "Pallas path implements the 3x3 SAME-padded conv"
        self.c_in, self.c_out, self.k = c_in, c_out, k
        kw, kb = jax.random.split(key)
        bound = 1.0 / jnp.sqrt(c_in * k * k)
        self.weight = jax.random.uniform(
            kw, (c_out, c_in, k, k), jnp.float32, -bound, bound)
        self.bias = jax.random.uniform(kb, (c_out,), jnp.float32, -bound, bound)
        # Pack once at init: tap-major [9, C_out, C_in] bf16, tap = ky*3 + kx.
        self.w_taps = self.weight.transpose(2, 3, 0, 1).reshape(
            k * k, c_out, c_in).astype(jnp.bfloat16)
        self.bias_col = self.bias.reshape(c_out, 1).astype(jnp.float32)

    def __call__(self, x):
        return conv3x3_silu_pallas(x, self.w_taps, self.bias_col)


# ---------------------------------------------------------------------------
# WrapperModel: pure delegation (exact semantics of the PyTorch module)
# ---------------------------------------------------------------------------
class WrapperModel:
    def __init__(self, model):
        self.model = model

    def __call__(self, *args, **kwargs):
        # forward(*args, **kwargs) -> self.model(*args, **kwargs)
        return self.model(*args, **kwargs)


# ---------------------------------------------------------------------------
# Pure-JAX reference (same bf16 rounding of inputs/weights, f32 accumulation)
# ---------------------------------------------------------------------------
def _reference(inner, x):
    xb = x.astype(jnp.bfloat16).astype(jnp.float32)
    wb = inner.weight.astype(jnp.bfloat16).astype(jnp.float32)
    y = jax.lax.conv_general_dilated(
        xb, wb, window_strides=(1, 1), padding="SAME",
        dimension_numbers=("NCHW", "OIHW", "NCHW"))
    y = y + inner.bias.reshape(1, -1, 1, 1)
    return y * jax.nn.sigmoid(y)


if __name__ == "__main__":
    key = jax.random.PRNGKey(0)
    k_model, k_x = jax.random.split(key)

    inner = InnerConvSiLU(k_model, c_in=4, c_out=8, k=3)
    model = WrapperModel(inner)

    x = jax.random.normal(k_x, (2, 4, 16, 16), jnp.float32)  # NCHW

    out = jax.block_until_ready(model(x))
    ref = jax.block_until_ready(_reference(inner, x))

    assert out.shape == (2, 8, 16, 16), out.shape
    err = float(jnp.max(jnp.abs(out - ref)))
    assert jnp.allclose(out, ref, atol=1e-3, rtol=1e-3), err

    print("KERNEL_OK")
</pallas_src>

<mosaic_0001>
module attributes {stable_mosaic.version = 11 : i64} {
  func.func @_conv3x3_silu_kernel(%arg0: i32, %arg1: memref<1x4x512xbf16, #tpu.memory_space<vmem>>, %arg2: memref<9x8x4xbf16, #tpu.memory_space<vmem>>, %arg3: memref<8x1xf32, #tpu.memory_space<vmem>>, %arg4: memref<1x8x384xf32, #tpu.memory_space<vmem>>) attributes {dimension_semantics = [#tpu.dimension_semantics<parallel>], iteration_bounds = array<i64: 2>, scalar_prefetch = 0 : i64, scratch_operands = 0 : i64, tpu.core_type = #tpu.core_type<tc>, window_params = [{transform_indices = @transform_0, window_bounds = array<i64: 1, 4, 512>}, {pipeline_mode = #tpu.pipeline_mode<synchronous>, transform_indices = @transform_1, window_bounds = array<i64: 9, 8, 4>}, {pipeline_mode = #tpu.pipeline_mode<synchronous>, transform_indices = @transform_2, window_bounds = array<i64: 8, 1>}, {transform_indices = @transform_3, window_bounds = array<i64: 1, 8, 384>}]} {
    %cst = arith.constant 0.000000e+00 : f32
    %0 = vector.broadcast %cst : f32 to vector<8x384xf32>
    %c0 = arith.constant 0 : index
    %c0_0 = arith.constant 0 : index
    %c0_1 = arith.constant 0 : index
    %1 = vector.load %arg2[%c0, %c0_0, %c0_1] : memref<9x8x4xbf16, #tpu.memory_space<vmem>>, vector<1x8x4xbf16>
    %2 = vector.shape_cast %1 : vector<1x8x4xbf16> to vector<8x4xbf16>
    %c0_2 = arith.constant 0 : index
    %c0_3 = arith.constant 0 : index
    %c0_4 = arith.constant 0 : index
    %3 = vector.load %arg1[%c0_2, %c0_3, %c0_4] : memref<1x4x512xbf16, #tpu.memory_space<vmem>>, vector<1x4x384xbf16>
    %4 = vector.shape_cast %3 : vector<1x4x384xbf16> to vector<4x384xbf16>
    %cst_5 = arith.constant dense<0.000000e+00> : vector<8x384xf32>
    %5 = tpu.matmul %2, %4, %cst_5 {dimension_numbers = #tpu.dot_dimension_numbers<[1], [0], [0], [1], [0, 0, 1, 1], [], []>} : vector<8x4xbf16>, vector<4x384xbf16>, vector<8x384xf32> -> vector<8x384xf32>
    %6 = arith.addf %0, %5 : vector<8x384xf32>
    %c1 = arith.constant 1 : index
    %c0_6 = arith.constant 0 : index
    %c0_7 = arith.constant 0 : index
    %7 = vector.load %arg2[%c1, %c0_6, %c0_7] : memref<9x8x4xbf16, #tpu.memory_space<vmem>>, vector<1x8x4xbf16>
    %8 = vector.shape_cast %7 : vector<1x8x4xbf16> to vector<8x4xbf16>
    %c0_8 = arith.constant 0 : index
    %c0_9 = arith.constant 0 : index
    %c1_10 = arith.constant 1 : index
    %9 = vector.load %arg1[%c0_8, %c0_9, %c1_10] : memref<1x4x512xbf16, #tpu.memory_space<vmem>>, vector<1x4x384xbf16>
    %10 = vector.shape_cast %9 : vector<1x4x384xbf16> to vector<4x384xbf16>
    %cst_11 = arith.constant dense<0.000000e+00> : vector<8x384xf32>
    %11 = tpu.matmul %8, %10, %cst_11 {dimension_numbers = #tpu.dot_dimension_numbers<[1], [0], [0], [1], [0, 0, 1, 1], [], []>} : vector<8x4xbf16>, vector<4x384xbf16>, vector<8x384xf32> -> vector<8x384xf32>
    %12 = arith.addf %6, %11 : vector<8x384xf32>
    %c2 = arith.constant 2 : index
    %c0_12 = arith.constant 0 : index
    %c0_13 = arith.constant 0 : index
    %13 = vector.load %arg2[%c2, %c0_12, %c0_13] : memref<9x8x4xbf16, #tpu.memory_space<vmem>>, vector<1x8x4xbf16>
    %14 = vector.shape_cast %13 : vector<1x8x4xbf16> to vector<8x4xbf16>
    %c0_14 = arith.constant 0 : index
    %c0_15 = arith.constant 0 : index
    %c2_16 = arith.constant 2 : index
    %15 = vector.load %arg1[%c0_14, %c0_15, %c2_16] : memref<1x4x512xbf16, #tpu.memory_space<vmem>>, vector<1x4x384xbf16>
    %16 = vector.shape_cast %15 : vector<1x4x384xbf16> to vector<4x384xbf16>
    %cst_17 = arith.constant dense<0.000000e+00> : vector<8x384xf32>
    %17 = tpu.matmul %14, %16, %cst_17 {dimension_numbers = #tpu.dot_dimension_numbers<[1], [0], [0], [1], [0, 0, 1, 1], [], []>} : vector<8x4xbf16>, vector<4x384xbf16>, vector<8x384xf32> -> vector<8x384xf32>
    %18 = arith.addf %12, %17 : vector<8x384xf32>
    %c3 = arith.constant 3 : index
    %c0_18 = arith.constant 0 : index
    %c0_19 = arith.constant 0 : index
    %19 = vector.load %arg2[%c3, %c0_18, %c0_19] : memref<9x8x4xbf16, #tpu.memory_space<vmem>>, vector<1x8x4xbf16>
    %20 = vector.shape_cast %19 : vector<1x8x4xbf16> to vector<8x4xbf16>
    %c0_20 = arith.constant 0 : index
    %c0_21 = arith.constant 0 : index
    %c18 = arith.constant 18 : index
    %21 = vector.load %arg1[%c0_20, %c0_21, %c18] : memref<1x4x512xbf16, #tpu.memory_space<vmem>>, vector<1x4x384xbf16>
    %22 = vector.shape_cast %21 : vector<1x4x384xbf16> to vector<4x384xbf16>
    %cst_22 = arith.constant dense<0.000000e+00> : vector<8x384xf32>
    %23 = tpu.matmul %20, %22, %cst_22 {dimension_numbers = #tpu.dot_dimension_numbers<[1], [0], [0], [1], [0, 0, 1, 1], [], []>} : vector<8x4xbf16>, vector<4x384xbf16>, vector<8x384xf32> -> vector<8x384xf32>
    %24 = arith.addf %18, %23 : vector<8x384xf32>
    %c4 = arith.constant 4 : index
    %c0_23 = arith.constant 0 : index
    %c0_24 = arith.constant 0 : index
    %25 = vector.load %arg2[%c4, %c0_23, %c0_24] : memref<9x8x4xbf16, #tpu.memory_space<vmem>>, vector<1x8x4xbf16>
    %26 = vector.shape_cast %25 : vector<1x8x4xbf16> to vector<8x4xbf16>
    %c0_25 = arith.constant 0 : index
    %c0_26 = arith.constant 0 : index
    %c19 = arith.constant 19 : index
    %27 = vector.load %arg1[%c0_25, %c0_26, %c19] : memref<1x4x512xbf16, #tpu.memory_space<vmem>>, vector<1x4x384xbf16>
    %28 = vector.shape_cast %27 : vector<1x4x384xbf16> to vector<4x384xbf16>
    %cst_27 = arith.constant dense<0.000000e+00> : vector<8x384xf32>
    %29 = tpu.matmul %26, %28, %cst_27 {dimension_numbers = #tpu.dot_dimension_numbers<[1], [0], [0], [1], [0, 0, 1, 1], [], []>} : vector<8x4xbf16>, vector<4x384xbf16>, vector<8x384xf32> -> vector<8x384xf32>
    %30 = arith.addf %24, %29 : vector<8x384xf32>
    %c5 = arith.constant 5 : index
    %c0_28 = arith.constant 0 : index
    %c0_29 = arith.constant 0 : index
    %31 = vector.load %arg2[%c5, %c0_28, %c0_29] : memref<9x8x4xbf16, #tpu.memory_space<vmem>>, vector<1x8x4xbf16>
    %32 = vector.shape_cast %31 : vector<1x8x4xbf16> to vector<8x4xbf16>
    %c0_30 = arith.constant 0 : index
    %c0_31 = arith.constant 0 : index
    %c20 = arith.constant 20 : index
    %33 = vector.load %arg1[%c0_30, %c0_31, %c20] : memref<1x4x512xbf16, #tpu.memory_space<vmem>>, vector<1x4x384xbf16>
    %34 = vector.shape_cast %33 : vector<1x4x384xbf16> to vector<4x384xbf16>
    %cst_32 = arith.constant dense<0.000000e+00> : vector<8x384xf32>
    %35 = tpu.matmul %32, %34, %cst_32 {dimension_numbers = #tpu.dot_dimension_numbers<[1], [0], [0], [1], [0, 0, 1, 1], [], []>} : vector<8x4xbf16>, vector<4x384xbf16>, vector<8x384xf32> -> vector<8x384xf32>
    %36 = arith.addf %30, %35 : vector<8x384xf32>
    %c6 = arith.constant 6 : index
    %c0_33 = arith.constant 0 : index
    %c0_34 = arith.constant 0 : index
    %37 = vector.load %arg2[%c6, %c0_33, %c0_34] : memref<9x8x4xbf16, #tpu.memory_space<vmem>>, vector<1x8x4xbf16>
    %38 = vector.shape_cast %37 : vector<1x8x4xbf16> to vector<8x4xbf16>
    %c0_35 = arith.constant 0 : index
    %c0_36 = arith.constant 0 : index
    %c36 = arith.constant 36 : index
    %39 = vector.load %arg1[%c0_35, %c0_36, %c36] : memref<1x4x512xbf16, #tpu.memory_space<vmem>>, vector<1x4x384xbf16>
    %40 = vector.shape_cast %39 : vector<1x4x384xbf16> to vector<4x384xbf16>
    %cst_37 = arith.constant dense<0.000000e+00> : vector<8x384xf32>
    %41 = tpu.matmul %38, %40, %cst_37 {dimension_numbers = #tpu.dot_dimension_numbers<[1], [0], [0], [1], [0, 0, 1, 1], [], []>} : vector<8x4xbf16>, vector<4x384xbf16>, vector<8x384xf32> -> vector<8x384xf32>
    %42 = arith.addf %36, %41 : vector<8x384xf32>
    %c7 = arith.constant 7 : index
    %c0_38 = arith.constant 0 : index
    %c0_39 = arith.constant 0 : index
    %43 = vector.load %arg2[%c7, %c0_38, %c0_39] : memref<9x8x4xbf16, #tpu.memory_space<vmem>>, vector<1x8x4xbf16>
    %44 = vector.shape_cast %43 : vector<1x8x4xbf16> to vector<8x4xbf16>
    %c0_40 = arith.constant 0 : index
    %c0_41 = arith.constant 0 : index
    %c37 = arith.constant 37 : index
    %45 = vector.load %arg1[%c0_40, %c0_41, %c37] : memref<1x4x512xbf16, #tpu.memory_space<vmem>>, vector<1x4x384xbf16>
    %46 = vector.shape_cast %45 : vector<1x4x384xbf16> to vector<4x384xbf16>
    %cst_42 = arith.constant dense<0.000000e+00> : vector<8x384xf32>
    %47 = tpu.matmul %44, %46, %cst_42 {dimension_numbers = #tpu.dot_dimension_numbers<[1], [0], [0], [1], [0, 0, 1, 1], [], []>} : vector<8x4xbf16>, vector<4x384xbf16>, vector<8x384xf32> -> vector<8x384xf32>
    %48 = arith.addf %42, %47 : vector<8x384xf32>
    %c8 = arith.constant 8 : index
    %c0_43 = arith.constant 0 : index
    %c0_44 = arith.constant 0 : index
    %49 = vector.load %arg2[%c8, %c0_43, %c0_44] : memref<9x8x4xbf16, #tpu.memory_space<vmem>>, vector<1x8x4xbf16>
    %50 = vector.shape_cast %49 : vector<1x8x4xbf16> to vector<8x4xbf16>
    %c0_45 = arith.constant 0 : index
    %c0_46 = arith.constant 0 : index
    %c38 = arith.constant 38 : index
    %51 = vector.load %arg1[%c0_45, %c0_46, %c38] : memref<1x4x512xbf16, #tpu.memory_space<vmem>>, vector<1x4x384xbf16>
    %52 = vector.shape_cast %51 : vector<1x4x384xbf16> to vector<4x384xbf16>
    %cst_47 = arith.constant dense<0.000000e+00> : vector<8x384xf32>
    %53 = tpu.matmul %50, %52, %cst_47 {dimension_numbers = #tpu.dot_dimension_numbers<[1], [0], [0], [1], [0, 0, 1, 1], [], []>} : vector<8x4xbf16>, vector<4x384xbf16>, vector<8x384xf32> -> vector<8x384xf32>
    %54 = arith.addf %48, %53 : vector<8x384xf32>
    %c0_48 = arith.constant 0 : index
    %c0_49 = arith.constant 0 : index
    %55 = vector.load %arg3[%c0_48, %c0_49] : memref<8x1xf32, #tpu.memory_space<vmem>>, vector<8x1xf32>
    %56 = vector.broadcast %55 : vector<8x1xf32> to vector<8x384xf32>
    %57 = arith.addf %54, %56 : vector<8x384xf32>
    %58 = arith.negf %57 : vector<8x384xf32>
    %59 = math.exp %58 : vector<8x384xf32>
    %cst_50 = arith.constant 1.000000e+00 : f32
    %60 = vector.broadcast %cst_50 : f32 to vector<8x384xf32>
    %61 = arith.addf %60, %59 : vector<8x384xf32>
    %62 = arith.divf %60, %61 : vector<8x384xf32>
    %63 = arith.mulf %57, %62 : vector<8x384xf32>
    %c0_51 = arith.constant 0 : index
    %c0_52 = arith.constant 0 : index
    %c0_53 = arith.constant 0 : index
    %64 = vector.load %arg4[%c0_51, %c0_52, %c0_53] : memref<1x8x384xf32, #tpu.memory_space<vmem>>, vector<1x8x384xf32>
    %65 = vector.shape_cast %64 : vector<1x8x384xf32> to vector<8x384xf32>
    %66 = vector.shape_cast %63 : vector<8x384xf32> to vector<1x8x384xf32>
    tpu.vector_store %arg4[%c0_51, %c0_52, %c0_53], %66 {strides = array<i32>} : memref<1x8x384xf32, #tpu.memory_space<vmem>>, vector<1x8x384xf32>,
    return
  }
  func.func @transform_0(%arg0: i32) -> (i32, i32, i32) {
    %c0_i32 = arith.constant 0 : i32
    %c0_i32_0 = arith.constant 0 : i32
    %c0_i32_1 = arith.constant 0 : i32
    return %arg0, %c0_i32, %c0_i32_0 : i32, i32, i32
  }
  func.func @transform_1(%arg0: i32) -> (i32, i32, i32) {
    %c0_i32 = arith.constant 0 : i32
    %c0_i32_0 = arith.constant 0 : i32
    %c0_i32_1 = arith.constant 0 : i32
    %c0_i32_2 = arith.constant 0 : i32
    return %c0_i32, %c0_i32_0, %c0_i32_1 : i32, i32, i32
  }
  func.func @transform_2(%arg0: i32) -> (i32, i32) {
    %c0_i32 = arith.constant 0 : i32
    %c0_i32_0 = arith.constant 0 : i32
    %c0_i32_1 = arith.constant 0 : i32
    return %c0_i32, %c0_i32_0 : i32, i32
  }
  func.func @transform_3(%arg0: i32) -> (i32, i32, i32) {
    %c0_i32 = arith.constant 0 : i32
    %c0_i32_0 = arith.constant 0 : i32
    %c0_i32_1 = arith.constant 0 : i32
    return %arg0, %c0_i32, %c0_i32_0 : i32, i32, i32
  }
}

</mosaic_0001>

<bundles_post_ra>
// kernel: conv3x3_silu_pallas.1
= control target key start
LH: loop header
LB: loop body
LE: loop exit
PB: predicated region body
PF: predicated region fallthrough
CT: control target
= control target key end

     0   :  { %s1600_s12 = smov 0   ;;  %s1741_s0 = inlined_call_operand.vmem [shape: bf16[2,4,512], index: 0, kind: input, shape index: {}]   ;;  %s1742_s1 = inlined_call_operand.vmem [shape: bf16[9,8,4], index: 1, kind: input, shape index: {}]   ;;  %s1743_s2 = inlined_call_operand.vmem [shape: f32[8,1], index: 2, kind: input, shape index: {}]   ;;  %s1744_s3 = inlined_call_operand.vmem [shape: f32[2,8,384], index: 3, kind: output, shape index: {}]  }
   0x1 LB: > { %s1403_s13 = sadd.s32 4294967295, %s1566_s12   ;;  %p1407_p0 = scmp.ge.s32.totalorder %s1566_s12, 1  ;;  %s1566_s12 = sphi %s1600_s12, %s13_s12  }
   0x2   : > { %p137_p1 = scmp.lt.s32.totalorder %s1566_s12, 3 }
   0x4   : > { %p138_p2 = pnand %p1407_p0, %p137_p1 }
   0x5   : > { %p161_p3 = scmp.lt.s32.totalorder (!%p138_p2), %s1403_s13, 1  ;;  %v182_v0 = vlaneseq (!%p138_p2)  ;;  %v1568_v1 = vmov (!%p138_p2), 1983009808   ;;  %v1569_v5 = vmov (!%p138_p2), 0.0   ;;  %v1570_v6 = vmov (!%p138_p2), 0   ;;  %s1572_s18 = smov (!%p138_p2), 127  }
   0x6   : > { %141 = sbr.rel (%p138_p2) target bundleno = 454 (0x1c6), region = 32  ;;  %v180_v2 = vunpack.c.l.s4 (!%p138_p2), %v1568_v1  ;;  %1470 = vmatprep.subr.bf16.mxu1 (!%p138_p2), %v1569_v5  ;;  %253 = vmatprep.mubr.bf16.mxu0 (!%p138_p2), %v1570_v6  ;;  %vm1571_vm0 = vmmov (!%p138_p2), 0   ;;  %s1573_s19 = smov (!%p138_p2), 126   ;;  %v1315_v18 = vld [vmem:[%s1743_s2] sm:$0xff] (!%p138_p2)  ;;  %vm203_vm1 = vcmask (!%p138_p2), 1039360   ;;  %vm211_vm2 = vcmask (!%p138_p2), 1041408  }
   0x7   : > { %v183_v3 = vshrl.u32 (!%p138_p2), %v182_v0, 7  ;;  %1545 = vset.pattern.permute.xlu0 (!%p138_p2), %v1570_v6  ;;  %1472 = vmatprep.mubr.msk.bf16.mxu1 (!%p138_p2), %vm1571_vm0, %v1569_v5  ;;  %s1574_s20 = smov (!%p138_p2), 110   ;;  %s1575_s21 = smov (!%p138_p2), 109   ;;  %v1411_v28 = vld [vmem:[%s1742_s1 + $0x4] sm:$0xf] (!%p138_p2)  ;;  %vm207_vm3 = vcmask (!%p138_p2), 31744  }
   0x8   : > { %v181_v4 = vunpack.c.0.s8 (!%p138_p2), %v180_v2  ;;  %s1576_s22 = smov (!%p138_p2), 108   ;;  %s1577_s23 = smov (!%p138_p2), 92   ;;  %vm441_vm4 = vcmask (!%p138_p2), 1031168   ;;  %v172_v39 = vld [vmem:[%s1742_s1] sm:$0xf] (!%p138_p2)  ;;  %vm570_vm5 = vcmask (!%p138_p2), 900096  }
   0x9   : > { %s1578_s24 = smov (!%p138_p2), 91   ;;  %s1579_s25 = smov (!%p138_p2), 90   ;;  %v1418_v49 = vld [vmem:[%s1742_s1 + $0x8] sm:$0xf] (!%p138_p2)  ;;  %vm699_vm6 = vcmask (!%p138_p2), 891904   ;;  %vm828_vm7 = vcmask (!%p138_p2), 883712  }
   0xa   : > { %v184_v7 = vsub.s32 (!%p138_p2), %v181_v4, %v183_v3  ;;  %v1422_v59 = vld [vmem:[%s1742_s1 + $0xc] sm:$0xf] (!%p138_p2)  ;;  %vm957_vm8 = vcmask (!%p138_p2), 752640   ;;  %vm1086_vm9 = vcmask (!%p138_p2), 744448   ;;  %vm1215_vm10 = vcmask (!%p138_p2), 736256  }
   0xd   : > { %s1746_s13 = smov (!%p161_p3, %s1403_s13), 1 }
   0xe   : > { %s1451_s14 = sshll.u32 %s1746_s13, 3 }
   0xf   : > { %s165_s17 = scalar_lea.vmem %s1741_s0, %s1451_s14 }
  0x10   : > { %v176_v8 = vld [vmem:[%s165_s17] sm:$0xff] }
  0x11   : > { %v173_v9 = vld [vmem:[%s165_s17] sm:$0x3f]  ;;  %v185_v10 = vrot.slane %v176_v8, %v184_v7  ;;  %v178_v11 = vcombine.high %v176_v8, %v176_v8 }
  0x12   : > { %v1619_v12 = vrot.slane %v173_v9, %v184_v7  ;;  %v303_v13 = vcombine.high %v173_v9, %v173_v9 }
  0x13   : > { %195 = vrot.lane.b32.xlu0 %v185_v10, %s1572_s18  ;;  %v193_v14 = vcombine.high %v185_v10, %v185_v10  ;;  %v192_v15 = vrot.slane %v178_v11, %v184_v7 }
  0x14   : > { %v1621_v16 = vrot.slane %v303_v13, %v184_v7  ;;  %v318_v22 = vcombine.high %v1619_v12, %v1619_v12  ;;  %v323_v31 = vsel %vm211_vm2, %v1619_v12, 0  ;;  %v1426_v7 = vld [vmem:[%s1742_s1 + $0x10] sm:$0xf] }
  0x15   : > { %199 = vrot.lane.b32.xlu1 %v192_v15, %s1572_s18  ;;  %v194_v17 = vcombine.high %v192_v15, %v192_v15 }
  0x16   : > { %v329_v33 = vsel %vm211_vm2, %v1621_v16, 0 }
  0x17   : > { %197 = vrot.lane.b32.xlu0 %v193_v14, %s1572_s18 }
  0x19   : > { %201 = vrot.lane.b32.xlu1 %v194_v17, %s1572_s18 }
  0x1b   : > { %433 = vrot.lane.b32.xlu0 %v185_v10, %s1573_s19 }
  0x1d   : > { %435 = vrot.lane.b32.xlu1 %v193_v14, %s1573_s19 }
  0x1f   : > { %437 = vrot.lane.b32.xlu0 %v192_v15, %s1573_s19 }
  0x21   : > { %439 = vrot.lane.b32.xlu1 %v194_v17, %s1573_s19 }
  0x23   : > { %562 = vrot.lane.b32.xlu0 %v185_v10, %s1574_s20 }
  0x25   : > { %564 = vrot.lane.b32.xlu1 %v193_v14, %s1574_s20 }
  0x27   : > { %566 = vrot.lane.b32.xlu0 %v192_v15, %s1574_s20 }
  0x29   : > { %568 = vrot.lane.b32.xlu1 %v194_v17, %s1574_s20 }
  0x2b   : > { %691 = vrot.lane.b32.xlu0 %v185_v10, %s1575_s21 }
  0x2d   : > { %693 = vrot.lane.b32.xlu1 %v193_v14, %s1575_s21 }
  0x2f   : > { %695 = vrot.lane.b32.xlu0 %v192_v15, %s1575_s21 }
  0x31   : > { %697 = vrot.lane.b32.xlu1 %v194_v17, %s1575_s21  ;;  %s1524_s21 = smul.u32 24, %s1746_s13 }
  0x33   : > { %820 = vrot.lane.b32.xlu0 %v185_v10, %s1576_s22 }
  0x35   : > { %822 = vrot.lane.b32.xlu1 %v193_v14, %s1576_s22 }
  0x37   : > { %824 = vrot.lane.b32.xlu0 %v192_v15, %s1576_s22 }
  0x39   : > { %826 = vrot.lane.b32.xlu1 %v194_v17, %s1576_s22 }
  0x3b   : > { %949 = vrot.lane.b32.xlu0 %v185_v10, %s1577_s23 }
  0x3d   : > { %951 = vrot.lane.b32.xlu1 %v193_v14, %s1577_s23 }
  0x3f   : > { %953 = vrot.lane.b32.xlu0 %v192_v15, %s1577_s23 }
  0x41   : > { %955 = vrot.lane.b32.xlu1 %v194_v17, %s1577_s23 }
  0x43   : > { %1078 = vrot.lane.b32.xlu0 %v185_v10, %s1578_s24 }
  0x45   : > { %1080 = vrot.lane.b32.xlu1 %v193_v14, %s1578_s24 }
  0x47   : > { %1082 = vrot.lane.b32.xlu0 %v192_v15, %s1578_s24 }
  0x49   : > { %1084 = vrot.lane.b32.xlu1 %v194_v17, %s1578_s24  ;;  %s170_s24 = scalar_lea.vmem %s1744_s3, %s1524_s21 }
  0x4b   : > { %1207 = vrot.lane.b32.xlu0 %v185_v10, %s1579_s25 }
  0x4d   : > { %1209 = vrot.lane.b32.xlu1 %v193_v14, %s1579_s25 }
  0x4f   : > { %1211 = vrot.lane.b32.xlu0 %v192_v15, %s1579_s25 }
  0x51   : > { %1213 = vrot.lane.b32.xlu1 %v194_v17, %s1579_s25  ;;  %v1430_v17 = vld [vmem:[%s1742_s1 + $0x14] sm:$0xf] }
  0x53   : > { %1318 = vperm.xlu0 %1545, %v1315_v18  }
  0x85   : > { %v196_v19 = vpop.permute.xlu0 %195 }
  0x87   : > { %v200_v20 = vpop.permute.xlu1 %199 }
  0x89   : > { %v198_v21 = vpop.permute.xlu0 %197 }
  0x8a   : > { %v205_v23 = vsel %vm203_vm1, %v198_v21, %v200_v20  ;;  %v204_v24 = vsel %vm203_vm1, %v196_v19, %v198_v21 }
  0x8b   : > { %1412 = vmatprep.subr.msk.bf16.mxu0 %vm211_vm2, %v205_v23  ;;  %v202_v25 = vpop.permute.xlu1 %201  ;;  %v213_v26 = vsel %vm211_vm2, %v204_v24, 0 }
  0x8c   : > { %222 = vmatpush1.bf16.msra.mxu0 %v213_v26  ;;  %v206_v27 = vsel %vm203_vm1, %v200_v20, %v202_v25 }
  0x8d   : > { %v219_v29 = vsel %vm211_vm2, %v206_v27, 0  ;;  %v434_v30 = vpop.permute.xlu0 %433  ;;  %1415 = vmatprep.subr.msk.bf16.mxu0 %vm211_vm2, %v318_v22  ;;  %v1434_v27 = vld [vmem:[%s1742_s1 + $0x18] sm:$0xf] }
  0x8e   : > { %1471 = vmatpush3.bf16.msra.mxu1 %v219_v29 }
  0x8f   : > { %1413 = vmatmul.mubr.msk.bf16.vlgmr.msra.gmra.mrb[0].mxu0 %vm207_vm3, %v1411_v28  ;;  %1476 = vmatprep.subr.bf16.mxu1 %v1569_v5  ;;  %v436_v32 = vpop.permute.xlu1 %435 }
  0x90   : > { %332 = vmatpush1.bf16.msra.mxu0 %v323_v31  ;;  %363 = vmatprep.mubr.bf16.mxu0 %v1570_v6  ;;  %v442_v35 = vsel %vm441_vm4, %v434_v30, %v436_v32 }
  0x91   : > { %1473 = vmatmul.mubr.msk.bf16.vlgmr.msra.gmra.mrb[0].mxu1 %vm207_vm3, %v1411_v28  ;;  %v438_v34 = vpop.permute.xlu0 %437  ;;  %v449_v40 = vsel %vm211_vm2, %v442_v35, 0 }
  0x92   : > { %1477 = vmatpush3.bf16.msra.mxu1 %v329_v33  ;;  %v443_v36 = vsel %vm441_vm4, %v436_v32, %v438_v34  ;;  %1478 = vmatprep.mubr.msk.bf16.mxu1 %vm1571_vm0, %v1569_v5 }
  0x93   : > { %1419 = vmatprep.subr.msk.bf16.mxu0 %vm211_vm2, %v443_v36  ;;  %v440_v37 = vpop.permute.xlu1 %439  ;;  %1482 = vmatprep.subr.bf16.mxu1 %v1569_v5 }
  0x94   : > { %v444_v38 = vsel %vm441_vm4, %v438_v34, %v440_v37  ;;  %v1438_v37 = vld [vmem:[%s1742_s1 + $0x1c] sm:$0xf] }
  0x95   : > { %v563_v41 = vpop.permute.xlu0 %562  ;;  %v455_v42 = vsel %vm211_vm2, %v444_v38, 0 }
  0x97   : > { %1416 = vmatmul.mubr.msk.bf16.vlgmr.msra.gmra.mrb[4].mxu0 %vm207_vm3, %v172_v39  ;;  %v565_v43 = vpop.permute.xlu1 %564 }
  0x98   : > { %458 = vmatpush1.bf16.msra.mxu0 %v449_v40  ;;  %489 = vmatprep.mubr.bf16.mxu0 %v1570_v6  ;;  %v571_v45 = vsel %vm570_vm5, %v563_v41, %v565_v43  ;;  %v1442_v40 = vld [vmem:[%s1742_s1 + $0x20] sm:$0xf] }
  0x99   : > { %1479 = vmatmul.mubr.msk.bf16.vlgmr.msra.gmra.mrb[4].mxu1 %vm207_vm3, %v172_v39  ;;  %v567_v44 = vpop.permute.xlu0 %566  ;;  %v578_v50 = vsel %vm211_vm2, %v571_v45, 0 }
  0x9a   : > { %1483 = vmatpush3.bf16.msra.mxu1 %v455_v42  ;;  %v572_v46 = vsel %vm570_vm5, %v565_v43, %v567_v44  ;;  %1484 = vmatprep.mubr.msk.bf16.mxu1 %vm1571_vm0, %v1569_v5 }
  0x9b   : > { %1423 = vmatprep.subr.msk.bf16.mxu0 %vm211_vm2, %v572_v46  ;;  %v569_v47 = vpop.permute.xlu1 %568  ;;  %1488 = vmatprep.subr.bf16.mxu1 %v1569_v5 }
  0x9c   : > { %v573_v48 = vsel %vm570_vm5, %v567_v44, %v569_v47 }
  0x9d   : > { %v692_v51 = vpop.permute.xlu0 %691  ;;  %v584_v52 = vsel %vm211_vm2, %v573_v48, 0 }
  0x9f   : > { %1420 = vmatmul.mubr.msk.bf16.vlgmr.msra.gmra.mrb[8].mxu0 %vm207_vm3, %v1418_v49  ;;  %v694_v53 = vpop.permute.xlu1 %693 }
  0xa0   : > { %587 = vmatpush1.bf16.msra.mxu0 %v578_v50  ;;  %618 = vmatprep.mubr.bf16.mxu0 %v1570_v6  ;;  %v700_v55 = vsel %vm699_vm6, %v692_v51, %v694_v53 }
  0xa1   : > { %1485 = vmatmul.mubr.msk.bf16.vlgmr.msra.gmra.mrb[8].mxu1 %vm207_vm3, %v1418_v49  ;;  %v696_v54 = vpop.permute.xlu0 %695  ;;  %v707_v60 = vsel %vm211_vm2, %v700_v55, 0 }
  0xa2   : > { %1489 = vmatpush3.bf16.msra.mxu1 %v584_v52  ;;  %v701_v56 = vsel %vm699_vm6, %v694_v53, %v696_v54  ;;  %1490 = vmatprep.mubr.msk.bf16.mxu1 %vm1571_vm0, %v1569_v5 }
  0xa3   : > { %1427 = vmatprep.subr.msk.bf16.mxu0 %vm211_vm2, %v701_v56  ;;  %v698_v57 = vpop.permute.xlu1 %697  ;;  %1494 = vmatprep.subr.bf16.mxu1 %v1569_v5 }
  0xa4   : > { %v702_v58 = vsel %vm699_vm6, %v696_v54, %v698_v57 }
  0xa5   : > { %v821_v61 = vpop.permute.xlu0 %820  ;;  %v713_v62 = vsel %vm211_vm2, %v702_v58, 0 }
  0xa7   : > { %1424 = vmatmul.mubr.msk.bf16.vlgmr.msra.gmra.mrb[12].mxu0 %vm207_vm3, %v1422_v59  ;;  %v823_v63 = vpop.permute.xlu1 %822 }
  0xa8   : > { %716 = vmatpush1.bf16.msra.mxu0 %v707_v60  ;;  %747 = vmatprep.mubr.bf16.mxu0 %v1570_v6  ;;  %v829_v1 = vsel %vm828_vm7, %v821_v61, %v823_v63 }
  0xa9   : > { %1491 = vmatmul.mubr.msk.bf16.vlgmr.msra.gmra.mrb[12].mxu1 %vm207_vm3, %v1422_v59  ;;  %v825_v0 = vpop.permute.xlu0 %824  ;;  %v836_v8 = vsel %vm211_vm2, %v829_v1, 0 }
  0xaa   : > { %1495 = vmatpush3.bf16.msra.mxu1 %v713_v62  ;;  %v830_v2 = vsel %vm828_vm7, %v823_v63, %v825_v0  ;;  %1496 = vmatprep.mubr.msk.bf16.mxu1 %vm1571_vm0, %v1569_v5 }
  0xab   : > { %1431 = vmatprep.subr.msk.bf16.mxu0 %vm211_vm2, %v830_v2  ;;  %v827_v3 = vpop.permute.xlu1 %826  ;;  %1500 = vmatprep.subr.bf16.mxu1 %v1569_v5 }
  0xac   : > { %v831_v4 = vsel %vm828_vm7, %v825_v0, %v827_v3 }
  0xad   : > { %v950_v9 = vpop.permute.xlu0 %949  ;;  %v842_v10 = vsel %vm211_vm2, %v831_v4, 0 }
  0xaf   : > { %1428 = vmatmul.mubr.msk.bf16.vlgmr.msra.gmra.mrb[16].mxu0 %vm207_vm3, %v1426_v7  ;;  %v952_v11 = vpop.permute.xlu1 %951 }
  0xb0   : > { %845 = vmatpush1.bf16.msra.mxu0 %v836_v8  ;;  %876 = vmatprep.mubr.bf16.mxu0 %v1570_v6  ;;  %v958_v13 = vsel %vm957_vm8, %v950_v9, %v952_v11 }
  0xb1   : > { %1497 = vmatmul.mubr.msk.bf16.vlgmr.msra.gmra.mrb[16].mxu1 %vm207_vm3, %v1426_v7  ;;  %v954_v12 = vpop.permute.xlu0 %953  ;;  %v965_v18 = vsel %vm211_vm2, %v958_v13, 0 }
  0xb2   : > { %1501 = vmatpush3.bf16.msra.mxu1 %v842_v10  ;;  %v959_v14 = vsel %vm957_vm8, %v952_v11, %v954_v12  ;;  %1502 = vmatprep.mubr.msk.bf16.mxu1 %vm1571_vm0, %v1569_v5 }
  0xb3   : > { %1435 = vmatprep.subr.msk.bf16.mxu0 %vm211_vm2, %v959_v14  ;;  %v956_v15 = vpop.permute.xlu1 %955  ;;  %1506 = vmatprep.subr.bf16.mxu1 %v1569_v5 }
  0xb4   : > { %v960_v16 = vsel %vm957_vm8, %v954_v12, %v956_v15 }
  0xb5   : > { %v1079_v19 = vpop.permute.xlu0 %1078  ;;  %v971_v20 = vsel %vm211_vm2, %v960_v16, 0 }
  0xb7   : > { %1432 = vmatmul.mubr.msk.bf16.vlgmr.msra.gmra.mrb[20].mxu0 %vm207_vm3, %v1430_v17  ;;  %v1081_v21 = vpop.permute.xlu1 %1080 }
  0xb8   : > { %974 = vmatpush1.bf16.msra.mxu0 %v965_v18  ;;  %1005 = vmatprep.mubr.bf16.mxu0 %v1570_v6  ;;  %v1087_v23 = vsel %vm1086_vm9, %v1079_v19, %v1081_v21 }
  0xb9   : > { %1503 = vmatmul.mubr.msk.bf16.vlgmr.msra.gmra.mrb[20].mxu1 %vm207_vm3, %v1430_v17  ;;  %v1083_v22 = vpop.permute.xlu0 %1082  ;;  %v1094_v28 = vsel %vm211_vm2, %v1087_v23, 0 }
  0xba   : > { %1507 = vmatpush3.bf16.msra.mxu1 %v971_v20  ;;  %v1088_v24 = vsel %vm1086_vm9, %v1081_v21, %v1083_v22  ;;  %1508 = vmatprep.mubr.msk.bf16.mxu1 %vm1571_vm0, %v1569_v5 }
  0xbb   : > { %1439 = vmatprep.subr.msk.bf16.mxu0 %vm211_vm2, %v1088_v24  ;;  %v1085_v25 = vpop.permute.xlu1 %1084  ;;  %1512 = vmatprep.subr.bf16.mxu1 %v1569_v5 }
  0xbc   : > { %v1089_v26 = vsel %vm1086_vm9, %v1083_v22, %v1085_v25 }
  0xbd   : > { %v1208_v29 = vpop.permute.xlu0 %1207  ;;  %v1100_v30 = vsel %vm211_vm2, %v1089_v26, 0 }
  0xbf   : > { %1436 = vmatmul.mubr.msk.bf16.vlgmr.msra.gmra.mrb[24].mxu0 %vm207_vm3, %v1434_v27  ;;  %v1210_v31 = vpop.permute.xlu1 %1209 }
  0xc0   : > { %1103 = vmatpush1.bf16.msra.mxu0 %v1094_v28  ;;  %1134 = vmatprep.mubr.bf16.mxu0 %v1570_v6  ;;  %v1216_v33 = vsel %vm1215_vm10, %v1208_v29, %v1210_v31 }
  0xc1   : > { %1509 = vmatmul.mubr.msk.bf16.vlgmr.msra.gmra.mrb[24].mxu1 %vm207_vm3, %v1434_v27  ;;  %v1212_v32 = vpop.permute.xlu0 %1211  ;;  %v1223_v38 = vsel %vm211_vm2, %v1216_v33, 0 }
  0xc2   : > { %1513 = vmatpush3.bf16.msra.mxu1 %v1100_v30  ;;  %v1217_v34 = vsel %vm1215_vm10, %v1210_v31, %v1212_v32  ;;  %1514 = vmatprep.mubr.msk.bf16.mxu1 %vm1571_vm0, %v1569_v5 }
  0xc3   : > { %1443 = vmatprep.subr.msk.bf16.mxu0 %vm211_vm2, %v1217_v34  ;;  %v1214_v35 = vpop.permute.xlu1 %1213  ;;  %1518 = vmatprep.subr.bf16.mxu1 %v1569_v5 }
  0xc4   : > { %v1218_v36 = vsel %vm1215_vm10, %v1212_v32, %v1214_v35 }
  0xc5   : > { %v1229_v39 = vsel %vm211_vm2, %v1218_v36, 0 }
  0xc7   : > { %1440 = vmatmul.mubr.msk.bf16.vlgmr.msra.gmra.mrb[28].mxu0 %vm207_vm3, %v1438_v37 }
  0xc8   : > { %1232 = vmatpush1.bf16.msra.mxu0 %v1223_v38  ;;  %1263 = vmatprep.mubr.bf16.mxu0 %v1570_v6 }
  0xc9   : > { %1515 = vmatmul.mubr.msk.bf16.vlgmr.msra.gmra.mrb[28].mxu1 %vm207_vm3, %v1438_v37 }
  0xca   : > { %1519 = vmatpush3.bf16.msra.mxu1 %v1229_v39  ;;  %1520 = vmatprep.mubr.msk.bf16.mxu1 %vm1571_vm0, %v1569_v5 }
  0xcf   : > { %1444 = vmatmul.mubr.msk.bf16.vlgmr.msra.gmra.mrb[32].mxu0 %vm207_vm3, %v1442_v40 }
  0xd1   : > { %1521 = vmatmul.mubr.msk.bf16.vlgmr.msra.gmra.mrb[32].mxu1 %vm207_vm3, %v1442_v40 }
 0x162   : > { %v255_v41 = vpop.f32.mrb[0].mxu0 }
 0x163   : > { %v257_v42 = vpop.f32.mrb[1].mxu0 }
 0x164   : > { %v259_v43 = vpop.f32.mrb[2].mxu0  ;;  %v296_v44 = vpop.f32.mrb[0].mxu1 }
 0x165   : > { %v260_v45 = vpop.f32.mrb[3].mxu0  ;;  %v1474_v6 = vpop.f32.mrb[1].mxu1 }
 0x166   : > { %v299_v46 = vpop.f32.mrb[2].mxu1 }
 0x167   : > { %v1475_v47 = vpop.f32.mrb[3].mxu1 }
 0x16a   : > { %v365_v48 = vpop.f32.mrb[4].mxu0 }
 0x16b   : > { %v366_v49 = vadd.f32 %v365_v48, %v255_v41  ;;  %v367_v50 = vpop.f32.mrb[5].mxu0 }
 0x16c   : > { %v368_v5 = vadd.f32 %v367_v50, %v257_v42  ;;  %v369_v51 = vpop.f32.mrb[6].mxu0  ;;  %v406_v52 = vpop.f32.mrb[4].mxu1 }
 0x16d   : > { %v407_v53 = vadd.f32 %v406_v52, %v296_v44  ;;  %v370_v54 = vpop.f32.mrb[7].mxu0  ;;  %v1480_v55 = vpop.f32.mrb[5].mxu1 }
 0x16e   : > { %v409_v56 = vpop.f32.mrb[6].mxu1 }
 0x16f   : > { %v1481_v57 = vpop.f32.mrb[7].mxu1 }
 0x172   : > { %v491_v58 = vpop.f32.mrb[8].mxu0 }
 0x173   : > { %v538_v59 = vadd.f32 %v491_v58, %v366_v49  ;;  %v493_v60 = vpop.f32.mrb[9].mxu0 }
 0x174   : > { %v539_v61 = vadd.f32 %v493_v60, %v368_v5  ;;  %v495_v62 = vpop.f32.mrb[10].mxu0  ;;  %v532_v63 = vpop.f32.mrb[8].mxu1 }
 0x175   : > { %v540_v0 = vadd.f32 %v532_v63, %v407_v53  ;;  %v496_v1 = vpop.f32.mrb[11].mxu0  ;;  %v1486_v2 = vpop.f32.mrb[9].mxu1 }
 0x176   : > { %v535_v3 = vpop.f32.mrb[10].mxu1 }
 0x177   : > { %v1487_v4 = vpop.f32.mrb[11].mxu1 }
 0x17a   : > { %v620_v7 = vpop.f32.mrb[12].mxu0 }
 0x17b   : > { %v667_v8 = vadd.f32 %v620_v7, %v538_v59  ;;  %v622_v9 = vpop.f32.mrb[13].mxu0 }
 0x17c   : > { %v668_v10 = vadd.f32 %v622_v9, %v539_v61  ;;  %v624_v11 = vpop.f32.mrb[14].mxu0  ;;  %v661_v12 = vpop.f32.mrb[12].mxu1 }
 0x17d   : > { %v669_v13 = vadd.f32 %v661_v12, %v540_v0  ;;  %v625_v14 = vpop.f32.mrb[15].mxu0  ;;  %v1492_v15 = vpop.f32.mrb[13].mxu1 }
 0x17e   : > { %v664_v16 = vpop.f32.mrb[14].mxu1  ;;  %v1319_v61 = vpop.permute.xlu0 %1318 }
 0x17f   : > { %v1493_v17 = vpop.f32.mrb[15].mxu1 }
 0x182   : > { %v749_v18 = vpop.f32.mrb[16].mxu0 }
 0x183   : > { %v796_v19 = vadd.f32 %v749_v18, %v667_v8  ;;  %v751_v20 = vpop.f32.mrb[17].mxu0 }
 0x184   : > { %v797_v21 = vadd.f32 %v751_v20, %v668_v10  ;;  %v753_v22 = vpop.f32.mrb[18].mxu0  ;;  %v790_v23 = vpop.f32.mrb[16].mxu1 }
 0x185   : > { %v798_v24 = vadd.f32 %v790_v23, %v669_v13  ;;  %v754_v25 = vpop.f32.mrb[19].mxu0  ;;  %v1498_v26 = vpop.f32.mrb[17].mxu1 }
 0x186   : > { %v793_v27 = vpop.f32.mrb[18].mxu1 }
 0x187   : > { %v1499_v28 = vpop.f32.mrb[19].mxu1 }
 0x18a   : > { %v878_v29 = vpop.f32.mrb[20].mxu0 }
 0x18b   : > { %v925_v30 = vadd.f32 %v878_v29, %v796_v19  ;;  %v880_v31 = vpop.f32.mrb[21].mxu0 }
 0x18c   : > { %v926_v32 = vadd.f32 %v880_v31, %v797_v21  ;;  %v882_v33 = vpop.f32.mrb[22].mxu0  ;;  %v919_v34 = vpop.f32.mrb[20].mxu1 }
 0x18d   : > { %v927_v35 = vadd.f32 %v919_v34, %v798_v24  ;;  %v883_v36 = vpop.f32.mrb[23].mxu0  ;;  %v1504_v37 = vpop.f32.mrb[21].mxu1 }
 0x18e   : > { %v922_v38 = vpop.f32.mrb[22].mxu1 }
 0x18f   : > { %v1505_v39 = vpop.f32.mrb[23].mxu1 }
 0x192   : > { %v1007_v40 = vpop.f32.mrb[24].mxu0 }
 0x193   : > { %v1054_v41 = vadd.f32 %v1007_v40, %v925_v30  ;;  %v1009_v42 = vpop.f32.mrb[25].mxu0 }
 0x194   : > { %v1055_v43 = vadd.f32 %v1009_v42, %v926_v32  ;;  %v1011_v44 = vpop.f32.mrb[26].mxu0  ;;  %v1048_v45 = vpop.f32.mrb[24].mxu1 }
 0x195   : > { %v1056_v6 = vadd.f32 %v1048_v45, %v927_v35  ;;  %v1012_v46 = vpop.f32.mrb[27].mxu0  ;;  %v1510_v47 = vpop.f32.mrb[25].mxu1 }
 0x196   : > { %v1051_v48 = vpop.f32.mrb[26].mxu1 }
 0x197   : > { %v1511_v49 = vpop.f32.mrb[27].mxu1 }
 0x19a   : > { %v1136_v50 = vpop.f32.mrb[28].mxu0 }
 0x19b   : > { %v1183_v5 = vadd.f32 %v1136_v50, %v1054_v41  ;;  %v1138_v51 = vpop.f32.mrb[29].mxu0 }
 0x19c   : > { %v1184_v52 = vadd.f32 %v1138_v51, %v1055_v43  ;;  %v1140_v53 = vpop.f32.mrb[30].mxu0  ;;  %v1177_v54 = vpop.f32.mrb[28].mxu1 }
 0x19d   : > { %v1185_v55 = vadd.f32 %v1177_v54, %v1056_v6  ;;  %v1141_v56 = vpop.f32.mrb[31].mxu0  ;;  %v1516_v57 = vpop.f32.mrb[29].mxu1 }
 0x19e   : > { %v1180_v58 = vpop.f32.mrb[30].mxu1 }
 0x19f   : > { %v1517_v59 = vpop.f32.mrb[31].mxu1 }
 0x1a2   : > { %v1265_v60 = vpop.f32.mrb[32].mxu0 }
 0x1a3   : > { %v1312_v62 = vadd.f32 %v1265_v60, %v1183_v5  ;;  %v1267_v63 = vpop.f32.mrb[33].mxu0 }
 0x1a4   : > { %v1313_v0 = vadd.f32 %v1267_v63, %v1184_v52  ;;  %v1269_v1 = vpop.f32.mrb[34].mxu0  ;;  %v1306_v2 = vpop.f32.mrb[32].mxu1 }
 0x1a5   : > { %v1321_v3 = vadd.f32 %v1319_v61, %v1312_v62  ;;  %v1314_v4 = vadd.f32 %v1306_v2, %v1185_v55  ;;  %v1270_v7 = vpop.f32.mrb[35].mxu0  ;;  %v1522_v8 = vpop.f32.mrb[33].mxu1 }
 0x1a6   : > { %v1322_v9 = vadd.f32 %v1319_v61, %v1313_v0  ;;  %v1309_v10 = vpop.f32.mrb[34].mxu1 }
 0x1a7   : > { %v1446_v11 = vmul.f32 -1.442695, %v1321_v3  ;;  %v1323_v12 = vadd.f32 %v1319_v61, %v1314_v4  ;;  %v1523_v13 = vpop.f32.mrb[35].mxu1 }
 0x1a8   : > { %v1447_v14 = vmul.f32 -1.442695, %v1322_v9 }
 0x1a9   : > { %1548 = vpow2.f32 %v1446_v11  ;;  %v1448_v15 = vmul.f32 -1.442695, %v1323_v12 }
 0x1aa   : > { %1550 = vpow2.f32 %v1447_v14 }
 0x1ab   : > { %1552 = vpow2.f32 %v1448_v15 }
 0x1b3   : > { %v1549_v16 = vpop.eup %1548 }
 0x1b4   : > { %v1551_v17 = vpop.eup %1550  ;;  %v1333_v18 = vadd.f32 1.0, %v1549_v16 }
 0x1b5   : > { %v1553_v19 = vpop.eup %1552  ;;  %v1334_v20 = vadd.f32 1.0, %v1551_v17 }
 0x1b6   : > { %1554 = vrcp.f32 %v1333_v18  ;;  %v1335_v21 = vadd.f32 1.0, %v1553_v19 }
 0x1b7   : > { %1556 = vrcp.f32 %v1334_v20 }
 0x1b8   : > { %1558 = vrcp.f32 %v1335_v21 }
 0x1c0   : > { %v1555_v22 = vpop.eup %1554 }
 0x1c1   : > { %v1557_v23 = vpop.eup %1556  ;;  %v1342_v24 = vmul.f32 %v1555_v22, %v1321_v3 }
 0x1c2   : > { %v1559_v25 = vpop.eup %1558  ;;  %v1343_v26 = vmul.f32 %v1557_v23, %v1322_v9 }
 0x1c3   : > { %1345 = vst [vmem:[%s170_s24] sm:$0xff] %v1342_v24  ;;  %v1344_v27 = vmul.f32 %v1559_v25, %v1323_v12 }
 0x1c4   : > { %1346 = vst [vmem:[%s170_s24 + $0x8] sm:$0xff] %v1343_v26 }
 0x1c5   : > { %1347 = vst [vmem:[%s170_s24 + $0x10] sm:$0xff] %v1344_v27 }
 0x1c6 PF: > { %s13_s12 = sadd.s32 1, %s1566_s12  }
 0x1c7   : > { %p10_p4 = scmp.ge.s32.totalorder %s13_s12, 4  }
 0x1c9   :  { %12 = sbr.rel (!%p10_p4) target bundleno = 1 (0x1), region = 70 }

</bundles_post_ra>
